<compile_context>
chip_gen: v7x
topology: tpu7x:2x2x1
jax: 0.10.0
libtpu: 0.0.40
codegen_flags: <defaults>
</compile_context>

<pallas_src>
import jax
import jax.numpy as jnp
from jax.experimental import pallas as pl
from jax.experimental.pallas import tpu as pltpu


def _lift_linear_kernel(x_ref, w_ref, b_ref, o_ref):
    # x_ref: (1, F_in,  T_TILE)  -- one batch row, one time tile
    # w_ref: (F_out, F_in)       -- same block every step (stays resident)
    # b_ref: (F_out, 1)
    # o_ref: (1, F_out, T_TILE)  -- lane-dense over time
    y = jnp.dot(w_ref[...], x_ref[0], preferred_element_type=jnp.float32)
    o_ref[0] = (y + b_ref[...]).astype(o_ref.dtype)


def _lift_call(x, weight, bias, *, t_tile):
    B, F_in, T = x.shape
    F_out = weight.shape[0]
    # Full tile when T is small; otherwise t_tile should be a multiple of 128
    # (default 512) so stores stay unmasked / lane-dense.
    t_tile = min(t_tile, T)
    grid = (B, pl.cdiv(T, t_tile))
    b2 = bias.reshape(F_out, 1)
    return pl.pallas_call(
        _lift_linear_kernel,
        out_shape=jax.ShapeDtypeStruct((B, F_out, T), x.dtype),
        grid=grid,
        in_specs=[
            # one batch row x one time tile per grid step
            pl.BlockSpec((1, F_in, t_tile), lambda b, t: (b, 0, t)),
            # weight / bias: identical block for every grid step
            pl.BlockSpec((F_out, F_in), lambda b, t: (0, 0)),
            pl.BlockSpec((F_out, 1), lambda b, t: (0, 0)),
        ],
        out_specs=pl.BlockSpec((1, F_out, t_tile), lambda b, t: (b, 0, t)),
        compiler_params=pltpu.CompilerParams(
            # both axes independent -> megacore / v7x dual-TC sharding
            dimension_semantics=("parallel", "parallel")),
    )(x, weight, b2)


def lift_linear(x, weight, bias, *, snn_process=True, t_tile=512):
    """Pallas equivalent of Lift(nn.Linear(F_in, F_out)).forward(x).

    x:      [B, F_in, T] (time last)  when snn_process=True
            [B, F_in]                 when snn_process=False
    weight: [F_out, F_in]  (PyTorch nn.Linear layout)
    bias:   [F_out]
    returns [B, F_out, T]  (or [B, F_out] when snn_process=False)

    Note: accumulation is in f32 (preferred_element_type) with a final cast
    back to x.dtype; for bf16 inputs this differs slightly (more accurately)
    from PyTorch's bf16-throughout arithmetic.
    """
    if not snn_process:
        # No lifting: a single application of the wrapped Linear (T == 1).
        out = _lift_call(x[..., None], weight, bias, t_tile=1)
        return out[..., 0]
    return _lift_call(x, weight, bias, t_tile=t_tile)


if __name__ == "__main__":
    # Small shapes consistent with the forward: batch=2, features 16 -> 32,
    # T=128 time steps (lane-dense time axis).
    B, F_IN, F_OUT, T = 2, 16, 32, 128

    key = jax.random.PRNGKey(0)
    kx, kw, kb = jax.random.split(key, 3)

    x = jax.random.normal(kx, (B, F_IN, T), dtype=jnp.float32)
    # Deterministic nn.Linear-style init (kaiming-uniform-ish bounds)
    w_bound = 1.0 / (F_IN ** 0.5)
    weight = jax.random.uniform(kw, (F_OUT, F_IN), jnp.float32, -w_bound, w_bound)
    bias = jax.random.uniform(kb, (F_OUT,), jnp.float32, -w_bound, w_bound)

    # Lifted path (snn_process=True)
    out = jax.block_until_ready(lift_linear(x, weight, bias, snn_process=True))
    ref = jnp.einsum("bit,oi->bot", x, weight) + bias[None, :, None]
    assert out.shape == (B, F_OUT, T), out.shape
    assert jnp.allclose(out, ref, atol=1e-5, rtol=1e-5), "mismatch vs reference"

    # Non-lifted path (snn_process=False): plain Linear.
    x2 = x[..., 0]
    out2 = jax.block_until_ready(lift_linear(x2, weight, bias, snn_process=False))
    ref2 = x2 @ weight.T + bias
    assert out2.shape == (B, F_OUT), out2.shape
    assert jnp.allclose(out2, ref2, atol=1e-5, rtol=1e-5), "mismatch (non-snn path)"

    print("KERNEL_OK")
</pallas_src>

<mosaic_0001>
module attributes {stable_mosaic.version = 11 : i64} {
  func.func @_lift_linear_kernel(%arg0: i32, %arg1: i32, %arg2: memref<1x16x128xf32, #tpu.memory_space<vmem>>, %arg3: memref<32x16xf32, #tpu.memory_space<vmem>>, %arg4: memref<32x1xf32, #tpu.memory_space<vmem>>, %arg5: memref<1x32x128xf32, #tpu.memory_space<vmem>>) attributes {dimension_semantics = [#tpu.dimension_semantics<parallel>, #tpu.dimension_semantics<parallel>], iteration_bounds = array<i64: 2, 1>, scalar_prefetch = 0 : i64, scratch_operands = 0 : i64, tpu.core_type = #tpu.core_type<tc>, window_params = [{transform_indices = @transform_0, window_bounds = array<i64: 1, 16, 128>}, {pipeline_mode = #tpu.pipeline_mode<synchronous>, transform_indices = @transform_1, window_bounds = array<i64: 32, 16>}, {pipeline_mode = #tpu.pipeline_mode<synchronous>, transform_indices = @transform_2, window_bounds = array<i64: 32, 1>}, {transform_indices = @transform_3, window_bounds = array<i64: 1, 32, 128>}]} {
    %c0 = arith.constant 0 : index
    %c0_0 = arith.constant 0 : index
    %0 = vector.load %arg3[%c0, %c0_0] : memref<32x16xf32, #tpu.memory_space<vmem>>, vector<32x16xf32>
    %c0_1 = arith.constant 0 : index
    %c0_2 = arith.constant 0 : index
    %c0_3 = arith.constant 0 : index
    %1 = vector.load %arg2[%c0_1, %c0_2, %c0_3] : memref<1x16x128xf32, #tpu.memory_space<vmem>>, vector<1x16x128xf32>
    %2 = vector.shape_cast %1 : vector<1x16x128xf32> to vector<16x128xf32>
    %cst = arith.constant dense<0.000000e+00> : vector<32x128xf32>
    %3 = tpu.matmul %0, %2, %cst {dimension_numbers = #tpu.dot_dimension_numbers<[1], [0], [0], [1], [0, 0, 1, 1], [], []>} : vector<32x16xf32>, vector<16x128xf32>, vector<32x128xf32> -> vector<32x128xf32>
    %c0_4 = arith.constant 0 : index
    %c0_5 = arith.constant 0 : index
    %4 = vector.load %arg4[%c0_4, %c0_5] : memref<32x1xf32, #tpu.memory_space<vmem>>, vector<32x1xf32>
    %5 = vector.broadcast %4 : vector<32x1xf32> to vector<32x128xf32>
    %6 = arith.addf %3, %5 : vector<32x128xf32>
    %c0_6 = arith.constant 0 : index
    %c0_7 = arith.constant 0 : index
    %c0_8 = arith.constant 0 : index
    %7 = vector.load %arg5[%c0_6, %c0_7, %c0_8] : memref<1x32x128xf32, #tpu.memory_space<vmem>>, vector<1x32x128xf32>
    %8 = vector.shape_cast %7 : vector<1x32x128xf32> to vector<32x128xf32>
    %9 = vector.shape_cast %6 : vector<32x128xf32> to vector<1x32x128xf32>
    tpu.vector_store %arg5[%c0_6, %c0_7, %c0_8], %9 {strides = array<i32>} : memref<1x32x128xf32, #tpu.memory_space<vmem>>, vector<1x32x128xf32>,
    return
  }
  func.func @transform_0(%arg0: i32, %arg1: i32) -> (i32, i32, i32) {
    %c0_i32 = arith.constant 0 : i32
    %c0_i32_0 = arith.constant 0 : i32
    return %arg0, %c0_i32, %arg1 : i32, i32, i32
  }
  func.func @transform_1(%arg0: i32, %arg1: i32) -> (i32, i32) {
    %c0_i32 = arith.constant 0 : i32
    %c0_i32_0 = arith.constant 0 : i32
    %c0_i32_1 = arith.constant 0 : i32
    return %c0_i32, %c0_i32_0 : i32, i32
  }
  func.func @transform_2(%arg0: i32, %arg1: i32) -> (i32, i32) {
    %c0_i32 = arith.constant 0 : i32
    %c0_i32_0 = arith.constant 0 : i32
    %c0_i32_1 = arith.constant 0 : i32
    return %c0_i32, %c0_i32_0 : i32, i32
  }
  func.func @transform_3(%arg0: i32, %arg1: i32) -> (i32, i32, i32) {
    %c0_i32 = arith.constant 0 : i32
    %c0_i32_0 = arith.constant 0 : i32
    return %arg0, %c0_i32, %arg1 : i32, i32, i32
  }
}

</mosaic_0001>

<bundles_post_ra>
// kernel: tpu_custom_call.1
= control target key start
LH: loop header
LB: loop body
LE: loop exit
PB: predicated region body
PF: predicated region fallthrough
CT: control target
= control target key end

     0   :  { %8 = vsyncpa [#allocation3], 0  ;;  %s767_s0 = inlined_call_operand.vmem [shape: f32[2,16,128], index: 0, kind: input, shape index: {}]   ;;  %s768_s1 = inlined_call_operand.vmem [shape: f32[32,16], index: 1, kind: input, shape index: {}]   ;;  %s769_s2 = inlined_call_operand.vmem [shape: f32[32,1], index: 2, kind: input, shape index: {}]   ;;  %s770_s3 = inlined_call_operand.hbm [shape: f32[2,32,128], index: 3, kind: output, shape index: {}]  }
   0x1   :  { %10 = vsyncpa [#allocation3 + $0x1], 0  ;;  %s624_s12 = smov 0   ;;  %s626_s13 = smov 0  }
   0x2   :  { %s628_s14 = smov 0   ;;  %s630_s15 = smov 0  }
   0x3   :  { %s632_s16 = smov 0   ;;  %s634_s17 = smov 0  }
   0x4 LB: > { %s419_s18 = sadd.s32 4294967295, %s598_s17   ;;  %s420_s19 = sadd.s32 4294967294, %s598_s17   ;;  %s598_s17 = sphi %s634_s17, %s16_s17   ;;  %s594_s16 = sphi %s632_s16, %s777_s16   ;;  %s590_s15 = sphi %s630_s15, %s776_s15   ;;  %s586_s14 = sphi %s628_s14, %s775_s14   ;;  %s582_s13 = sphi %s626_s13, %s774_s13   ;;  %s578_s12 = sphi %s624_s12, %s773_s12  }
   0x5   : > { %s28_s20 = sadd.s32 1, %s594_s16  ;;  %s107_s21 = sadd.s32 1, %s586_s14 }
   0x6   : > { %p30_p0 = scmp.ge.s32.totalorder %s28_s20, 2  ;;  %p117_p1 = scmp.ne.s32.totalorder %s586_s14, %s582_s13 }
   0x7   : > { %p118_p2 = scmp.eq.s32.totalorder %s419_s18, 1  ;;  %p123_p3 = scmp.ne.s32.totalorder %s582_s13, %s578_s12 }
   0x8   : > { %s779_s20 = smov (%p30_p0, %s28_s20), 0  ;;  %p124_p5 = scmp.eq.s32.totalorder %s420_s19, 1 }
   0x9   : > { %p664_p4 = por %p118_p2, %p117_p1  ;;  %s102_s23 = ssub.s32 %s594_s16, %s779_s20 }
   0xa   : > { %p423_p6 = scmp.ge.s32.totalorder %s598_s17, 1  ;;  %p105_p7 = scmp.eq.s32.totalorder %s102_s23, 0 }
   0xb   : > { %p671_p8 = por %p124_p5, %p123_p3  ;;  %p159_p9 = scmp.lt.s32.totalorder %s598_s17, 3 }
   0xc   : > { %s677_s25 = scalar_select %p105_p7, %s586_s14, %s107_s21  }
   0xd   : > { %p160_p10 = pnand %p423_p6, %p159_p9 }
   0xe   : > { %p186_p11 = scmp.lt.s32.totalorder (!%p160_p10), %s590_s15, 1  ;;  %v194_v0 = vld [vmem:[%s768_s1] sm:$0xff] (!%p160_p10)  ;;  %vm224_vm0 = vcmask (!%p160_p10), 130048   ;;  %v196_v1 = vld [vmem:[%s768_s1 + $0x10] sm:$0xff] (!%p160_p10)  ;;  %v600_v4 = vmov (!%p160_p10), 0   ;;  %v203_v5 = vld [vmem:[%s769_s2 + $0x18] sm:$0xff] (!%p160_p10) }
   0xf   : > { %163 = sbr.rel (%p160_p10) target bundleno = 263 (0x107), region = 32  ;;  %448 = vmatprep.mubr.msk.f32.mxu0 (!%p160_p10), %vm224_vm0, %v194_v0  ;;  %451 = vmatprep.mubr.msk.f32.mxu1 (!%p160_p10), %vm224_vm0, %v196_v1  ;;  %v202_v2 = vld [vmem:[%s769_s2 + $0x10] sm:$0xff] (!%p160_p10)  ;;  %v200_v3 = vld [vmem:[%s769_s2] sm:$0xff] (!%p160_p10)  ;;  %v201_v6 = vld [vmem:[%s769_s2 + $0x8] sm:$0xff] (!%p160_p10)  ;;  %s183_s30 = sand.u32 (!%p160_p10), 1, %s582_s13  }
  0x10   : > { %519 = vset.pattern.permute.xlu1 (!%p160_p10), %v600_v4  ;;  %518 = vset.pattern.permute.xlu0 (!%p160_p10), %v600_v4  ;;  %v195_v10 = vld [vmem:[%s768_s1 + $0x8] sm:$0xff] (!%p160_p10)  ;;  %v197_v11 = vld [vmem:[%s768_s1 + $0x18] sm:$0xff] (!%p160_p10)  ;;  %s424_s4 = sshll.u32 (!%p160_p10), %s183_s30, 5  ;;  %s601_s18 = smov (!%p160_p10), [#allocation2]  }
  0x11   : > { %216 = vperm.xlu1 (!%p160_p10), %519, %v202_v2   ;;  %206 = vperm.xlu0 (!%p160_p10), %518, %v200_v3   ;;  %s185_s5 = scalar_lea.vmem (!%p160_p10), [#allocation2], %s424_s4  ;;  %s524_s19 = sshll.u32 (!%p160_p10), %s601_s18, 4  ;;  %s525_s19 = int_to_ptr.vmem [resolvable:$false] %s524_s19 }
  0x12   : > { %s341_s6 = sshll.u32 (!%p160_p10), %s185_s5, 4  ;;  %s526_s21 = scalar_lea.vmem (!%p160_p10), %s525_s19, 1024  ;;  %s714_s6 = int_to_ptr.vmem [resolvable:$true] %s341_s6 }
  0x13   : > { %s520_s11 = scalar_lea.vmem (!%p160_p10), %s714_s6, 512  ;;  %p527_p1 = scmp.lt.s32.totalorder (!%p160_p10), %s714_s6, %s525_s19 }
  0x14   : > { %p521_p12 = scmp.ne.s32.totalorder (!%p160_p10), %s714_s6, %s520_s11  ;;  %p528_p2 = scmp.lt.s32.totalorder (!%p160_p10), %s526_s21, %s520_s11 }
  0x15   : > { %221 = vperm.xlu1 (!%p160_p10), %519, %v203_v5   ;;  %211 = vperm.xlu0 (!%p160_p10), %518, %v201_v6  }
  0x16   : > { %s187_s7 = scalar_select %p186_p11, %s590_s15, 1 }
  0x17   : > { %p522_p13 = pnand %p521_p12, %p664_p4  ;;  %p529_p3 = por %p528_p2, %p527_p1 }
  0x18   : > { %s436_s8 = sshll.u32 %s187_s7, 4  ;;  %s437_s7 = sshll.u32 %s590_s15, 9 }
  0x19   : > { %s193_s23 = scalar_lea.vmem %s767_s0, %s436_s8  ;;  %s719_s10 = scalar_lea.hbm %s770_s3, %s437_s7 }
  0x1a   : > { %v198_v7 = vld [vmem:[%s193_s23] sm:$0xff]  ;;  %v199_v8 = vld [vmem:[%s193_s23 + $0x8] sm:$0xff]  ;;  %s721_s15 = scalar_lea.sflag [#allocation3], %s183_s30  ;;  %p523_p0 = pneg %p522_p13 }
  0x1b   : > { %v454_v9 = vpack.c.bf16 %v199_v8, %v198_v7 }
  0x1c   : > { %p530_p5 = pnand %p529_p3, %p523_p0 }
  0x1d   : > { %455 = vmatprep.subr.bf16.mxu0 %v454_v9  ;;  %458 = vmatprep.subr.bf16.mxu1 %v454_v9 }
  0x1e   : > { %457 = vmatpush3.bf16.msra.mxu0 %v454_v9  ;;  %459 = vmatpush3.bf16.msra.mxu1 %v454_v9 }
  0x21   : > { %449 = vmatmul.mubr.msk.f32.vlgmr.msra.gmra.mrb[0].mxu0 %vm224_vm0, %v195_v10  ;;  %452 = vmatmul.mubr.msk.f32.vlgmr.msra.gmra.mrb[0].mxu1 %vm224_vm0, %v197_v11 }
  0x90   : > { %v217_v12 = vpop.permute.xlu1 %216  ;;  %v207_v13 = vpop.permute.xlu0 %206 }
  0x94   : > { %v222_v14 = vpop.permute.xlu1 %221  ;;  %v212_v15 = vpop.permute.xlu0 %211 }
  0xf4   : > { %v450_v16 = vpop.f32.mrb[0].mxu0  ;;  %v453_v17 = vpop.f32.mrb[0].mxu1 }
  0xf5   : > { %v309_v18 = vadd.f32 %v450_v16, %v212_v15  ;;  %v319_v19 = vadd.f32 %v453_v17, %v222_v14  ;;  %v303_v20 = vpop.f32.mrb[1].mxu0  ;;  %v313_v21 = vpop.f32.mrb[1].mxu1 }
  0xf6   : > { %v304_v22 = vadd.f32 %v303_v20, %v207_v13  ;;  %v314_v23 = vadd.f32 %v313_v21, %v217_v12 }
  0xf7   : > { %323 = vst [vmem:[%s185_s5 + $0x8] sm:$0xff] %v309_v18  ;;  %325 = vst [vmem:[%s185_s5 + $0x18] sm:$0xff] %v319_v19 }
  0xf8   : > { %322 = vst [vmem:[%s185_s5] sm:$0xff] %v304_v22  ;;  %324 = vst [vmem:[%s185_s5 + $0x10] sm:$0xff] %v314_v23 }
  0xf9   : > { %533 = shalt.err (!%p530_p5)
}
  0xfa   : > { %s534_s23 = scalar_lea.hbm %s719_s10, 512  ;;  %s538_s28 = scalar_lea.hbm %s770_s3, 1024 }
  0xfb   : > { %p535_p6 = scmp.ne.s32.totalorder %s719_s10, %s534_s23  ;;  %p539_p10 = scmp.lt.u32.totalorder %s719_s10, %s770_s3 }
  0xfc   : > { %p540_p11 = scmp.lt.u32.totalorder %s538_s28, %s534_s23  ;;  %p542_p13 = scmp.lt.u32.totalorder %s534_s23, %s719_s10 }
  0xfd   : > { %p536_p7 = pnand %p535_p6, %p664_p4 }
  0xfe   : > { %p541_p12 = por %p540_p11, %p539_p10 }
  0xff   : > { %p537_p9 = pneg %p536_p7 }
 0x100   : > { %p543_p0 = por %p542_p13, %p541_p12 }
 0x102   : > { %p544_p1 = pnand %p543_p0, %p537_p9 }
 0x104   : > { %547 = shalt.err (!%p544_p1)
}
 0x105   : > { %s602_s4 = smov 128   ;;  %s603_s5 = smov 8  }
 0x106   : > { %460 = dma.vmem_to_hbm [thread:$0]  (%p664_p4), %s714_s6, 512, %s719_s10, %s721_s15, %s602_s4, %s602_s4, %s603_s5  }
 0x107 PF: > { %p466_p2 = scmp.ge.s32.totalorder %s598_s17, 2  ;;  %s356_s7 = sand.u32 1, %s578_s12  }
 0x108   : > { %s357_s8 = scalar_lea.sflag [#allocation3], %s356_s7 }
 0x109   : > { %p463_p3 = pnand %p466_p2, %p671_p8 }
 0x10b   : > { %573 = dma.done.wait (!%p463_p3), %s357_s8, 512  }
 0x10c   : > { %575 = vsyncadd (!%p463_p3), %s357_s8, 4294966784  ;;  %s16_s17 = sadd.s32 1, %s598_s17   ;;  %s773_s12 = smov %s582_s13 }
 0x10d   : > { %p13_p5 = scmp.ge.s32.totalorder %s16_s17, 4   ;;  %s774_s13 = smov %s586_s14 }
 0x10e   : > { %s775_s14 = smov %s677_s25  ;;  %s776_s15 = smov %s594_s16 }
 0x10f   : > { %s777_s16 = smov %s779_s20  ;;  %15 = sbr.rel (!%p13_p5) target bundleno = 4 (0x4), region = 67 }
 0x116   :  { %362 = vsyncpa [#allocation3], 1 }
 0x117   :  { %364 = vsyncpa [#allocation3 + $0x1], 1 }

</bundles_post_ra>
